<compile_context>
chip_gen: v5e
topology: v5e:2x2
jax: 0.10.0
libtpu: 0.0.40
codegen_flags: <defaults>
</compile_context>

<pallas_src>
import jax
import jax.numpy as jnp
from jax import lax
from jax.experimental import pallas as pl
from jax.experimental.pallas import tpu as pltpu


def _round_up(x: int, m: int) -> int:
    return ((x + m - 1) // m) * m


# ---------------------------------------------------------------------------
# Primary path: VMEM-resident tables, one-hot MXU gather.
# ---------------------------------------------------------------------------
def _mf_vmem_kernel(nu_ref, nv_ref, user_ref, item_ref, out_ref):
    tile_b = nu_ref.shape[0]
    num_users = user_ref.shape[0]
    num_items = item_ref.shape[0]

    u_col = nu_ref[...]                                   # (tile_b, 1) int32
    v_col = nv_ref[...]                                   # (tile_b, 1) int32

    # One-hot gather through the MXU (tables are small & resident; MXU idle).
    iota_u = lax.broadcasted_iota(jnp.int32, (tile_b, num_users), 1)
    iota_v = lax.broadcasted_iota(jnp.int32, (tile_b, num_items), 1)
    oh_u = (u_col == iota_u).astype(jnp.float32)          # (tile_b, num_users)
    oh_v = (v_col == iota_v).astype(jnp.float32)          # (tile_b, num_items)

    e_u = jnp.dot(oh_u, user_ref[...].astype(jnp.float32),
                  preferred_element_type=jnp.float32)     # (tile_b, D)
    e_i = jnp.dot(oh_v, item_ref[...].astype(jnp.float32),
                  preferred_element_type=jnp.float32)     # (tile_b, D)

    # Row-wise dot on the VPU + XLU lane reduce; lane-dense (1, tile_b) write.
    row = jnp.sum(e_u * e_i, axis=-1)                     # (tile_b,)
    out_ref[...] = row.reshape(1, tile_b)


# ---------------------------------------------------------------------------
# Fallback path: tables stay in HBM, per-row DMA gather (counted semaphores,
# unrolled issue loop).  Only used when the tables do not fit the VMEM budget.
# ---------------------------------------------------------------------------
def _mf_hbm_gather_kernel(nodes_u_ref, nodes_v_ref,   # scalar-prefetch (SMEM)
                          user_hbm, item_hbm,         # tables (HBM, pl.ANY)
                          out_ref,                    # (1, tile_b) output
                          eu_buf, ei_buf, sems):      # VMEM scratch + 2 sems
    tile_b, _ = eu_buf.shape
    base = pl.program_id(0) * tile_b

    # Issue 2*tile_b row-gather DMAs against two counted semaphores; unrolled
    # so the LLO scheduler can co-issue SMEM index loads with descriptor pushes.
    def _issue(r, carry):
        u = nodes_u_ref[base + r]
        v = nodes_v_ref[base + r]
        pltpu.make_async_copy(user_hbm.at[pl.ds(u, 1), :],
                              eu_buf.at[pl.ds(r, 1), :], sems.at[0]).start()
        pltpu.make_async_copy(item_hbm.at[pl.ds(v, 1), :],
                              ei_buf.at[pl.ds(r, 1), :], sems.at[1]).start()
        return carry

    lax.fori_loop(0, tile_b, _issue, 0, unroll=8)

    # Accumulated wait: every row copy signals its semaphore by D*esize bytes;
    # waiting on a descriptor whose dst is the whole buffer decrements by
    # tile_b*D*esize, i.e. returns only once every row of this tile landed.
    pltpu.make_async_copy(eu_buf, eu_buf, sems.at[0]).wait()
    pltpu.make_async_copy(ei_buf, ei_buf, sems.at[1]).wait()

    # TODO(synk): double-buffer eu_buf/ei_buf across grid steps (prefetch tile
    # i+1's rows while computing tile i) if this HBM path ever dominates.

    eu = eu_buf[...].astype(jnp.float32)
    ei = ei_buf[...].astype(jnp.float32)
    out_ref[...] = jnp.sum(eu * ei, axis=-1).reshape(1, tile_b)


# ---------------------------------------------------------------------------
# Wrapper
# ---------------------------------------------------------------------------
def _choose_tile(B: int, tile_b_default: int):
    """Pick (tile_b, b_pad).  tile_b is a multiple of 8; multi-tile tile_b is a
    multiple of 128 (lane-dense output blocks).  Mid-size batches are split
    into exactly 2 tiles so v7x's two TensorCores both get work."""
    if B <= 128:
        tile_b = _round_up(max(B, 1), 8)          # single tile (block == array)
    elif B <= 2 * tile_b_default:
        tile_b = _round_up((B + 1) // 2, 128)     # exactly 2 tiles
    else:
        tile_b = tile_b_default                   # many tiles of default size
    b_pad = _round_up(B, tile_b)
    return tile_b, b_pad


def mf_baseline_forward(user_emb, item_emb, nodes_u, nodes_v, *,
                        tile_b=512, vmem_table_budget_bytes=16 * 1024 * 1024):
    """Pallas implementation of MF_baseline.forward.

    user_emb: (num_users, D), item_emb: (num_items, D) — float32 or bf16.
    nodes_u, nodes_v: (B,) integer indices.
    returns: (B, 1, 1) float32, matching torch.bmm((B,1,D),(B,D,1)).
    """
    B = int(nodes_u.shape[0])
    num_users, D = int(user_emb.shape[0]), int(user_emb.shape[1])
    num_items = int(item_emb.shape[0])

    tile_b_default = max(128, _round_up(int(tile_b), 128))
    tile_b, b_pad = _choose_tile(B, tile_b_default)
    num_tiles = b_pad // tile_b

    # Pad indices with 0 (a valid row); padded results are sliced off below.
    nu = jnp.zeros((b_pad,), jnp.int32).at[:B].set(nodes_u.astype(jnp.int32))
    nv = jnp.zeros((b_pad,), jnp.int32).at[:B].set(nodes_v.astype(jnp.int32))

    itemsize = jnp.dtype(user_emb.dtype).itemsize
    table_bytes = (num_users + num_items) * D * itemsize

    if table_bytes <= vmem_table_budget_bytes:
        # -------- VMEM-resident tables, one-hot MXU gather --------
        # Pipeline double-buffering makes actual VMEM use ~2.5x the raw table
        # bytes, so the default budget stays conservative enough for v7x's
        # 64 MiB physical VMEM as well as v5e/v6e.
        # TODO(synk): key the budget on pltpu.get_tpu_info() per generation.
        vmem_need = int(2.5 * table_bytes) + 16 * tile_b + (2 << 20)
        compiler_params = pltpu.CompilerParams(
            dimension_semantics=("parallel",),
            vmem_limit_bytes=(vmem_need if vmem_need > (16 << 20) else None),
        )
        cost = pl.CostEstimate(
            flops=2 * B * D * (num_users + num_items + 1),
            transcendentals=0,
            bytes_accessed=table_bytes + 2 * b_pad * 4 + b_pad * 4,
        )
        out = pl.pallas_call(
            _mf_vmem_kernel,
            out_shape=jax.ShapeDtypeStruct((1, b_pad), jnp.float32),
            grid_spec=pltpu.PrefetchScalarGridSpec(
                num_scalar_prefetch=0,
                grid=(num_tiles,),
                in_specs=[
                    pl.BlockSpec((tile_b, 1), lambda i: (i, 0)),        # u idx
                    pl.BlockSpec((tile_b, 1), lambda i: (i, 0)),        # v idx
                    pl.BlockSpec((num_users, D), lambda i: (0, 0)),     # user tbl
                    pl.BlockSpec((num_items, D), lambda i: (0, 0)),     # item tbl
                ],
                out_specs=pl.BlockSpec((1, tile_b), lambda i: (0, i)),
            ),
            compiler_params=compiler_params,
            cost_estimate=cost,
        )(nu.reshape(b_pad, 1), nv.reshape(b_pad, 1), user_emb, item_emb)
    else:
        # -------- fallback: HBM per-row DMA gather --------
        cost = pl.CostEstimate(
            flops=2 * B * D,
            transcendentals=0,
            bytes_accessed=2 * B * D * itemsize + 2 * b_pad * 4 + b_pad * 4,
        )
        out = pl.pallas_call(
            _mf_hbm_gather_kernel,
            out_shape=jax.ShapeDtypeStruct((1, b_pad), jnp.float32),
            grid_spec=pltpu.PrefetchScalarGridSpec(
                num_scalar_prefetch=2,
                grid=(num_tiles,),
                in_specs=[
                    pl.BlockSpec(memory_space=pl.ANY),   # user table in HBM
                    pl.BlockSpec(memory_space=pl.ANY),   # item table in HBM
                ],
                out_specs=pl.BlockSpec((1, tile_b),
                                       lambda i, nu_ref, nv_ref: (0, i)),
                scratch_shapes=[
                    pltpu.VMEM((tile_b, D), user_emb.dtype),
                    pltpu.VMEM((tile_b, D), item_emb.dtype),
                    pltpu.SemaphoreType.DMA((2,)),
                ],
            ),
            compiler_params=pltpu.CompilerParams(
                dimension_semantics=("parallel",),
            ),
            cost_estimate=cost,
        )(nu, nv, user_emb, item_emb)

    # Drop padding and match torch.bmm output shape (B, 1, 1).
    return out[0, :B].reshape(B, 1, 1)


if __name__ == "__main__":
    embed_dim = 32
    num_users = 16
    num_items = 24
    batch = 8

    key = jax.random.PRNGKey(0)
    k_u, k_i, k_nu, k_nv = jax.random.split(key, 4)

    # Deterministic synthetic parameters (nn.Embedding weights).
    user_emb = jax.random.normal(k_u, (num_users, embed_dim), dtype=jnp.float32)
    item_emb = jax.random.normal(k_i, (num_items, embed_dim), dtype=jnp.float32)

    # Deterministic synthetic inputs (node index batches).
    nodes_u = jax.random.randint(k_nu, (batch,), 0, num_users, dtype=jnp.int32)
    nodes_v = jax.random.randint(k_nv, (batch,), 0, num_items, dtype=jnp.int32)

    res = mf_baseline_forward(user_emb, item_emb, nodes_u, nodes_v)
    res = jax.block_until_ready(res)

    # Sanity check against plain-JAX reference.
    ref = jnp.einsum("bd,bd->b", user_emb[nodes_u],
                     item_emb[nodes_v]).reshape(batch, 1, 1)
    assert res.shape == (batch, 1, 1)
    assert jnp.allclose(res, ref, atol=1e-5, rtol=1e-5)

    print("KERNEL_OK")
</pallas_src>

<mosaic_0001>
module attributes {stable_mosaic.version = 11 : i64} {
  func.func @_mf_vmem_kernel(%arg0: i32, %arg1: memref<8x1xi32, #tpu.memory_space<vmem>>, %arg2: memref<8x1xi32, #tpu.memory_space<vmem>>, %arg3: memref<16x32xf32, #tpu.memory_space<vmem>>, %arg4: memref<24x32xf32, #tpu.memory_space<vmem>>, %arg5: memref<1x8xf32, #tpu.memory_space<vmem>>) attributes {dimension_semantics = [#tpu.dimension_semantics<parallel>], iteration_bounds = array<i64: 1>, scalar_prefetch = 0 : i64, scratch_operands = 0 : i64, tpu.core_type = #tpu.core_type<tc>, window_params = [{transform_indices = @transform_0, window_bounds = array<i64: 8, 1>}, {transform_indices = @transform_1, window_bounds = array<i64: 8, 1>}, {pipeline_mode = #tpu.pipeline_mode<synchronous>, transform_indices = @transform_2, window_bounds = array<i64: 16, 32>}, {pipeline_mode = #tpu.pipeline_mode<synchronous>, transform_indices = @transform_3, window_bounds = array<i64: 24, 32>}, {transform_indices = @transform_4, window_bounds = array<i64: 1, 8>}]} {
    %c0 = arith.constant 0 : index
    %c0_0 = arith.constant 0 : index
    %0 = vector.load %arg1[%c0, %c0_0] : memref<8x1xi32, #tpu.memory_space<vmem>>, vector<8x1xi32>
    %c0_1 = arith.constant 0 : index
    %c0_2 = arith.constant 0 : index
    %1 = vector.load %arg2[%c0_1, %c0_2] : memref<8x1xi32, #tpu.memory_space<vmem>>, vector<8x1xi32>
    %2 = tpu.iota {dimensions = array<i32: 1>} : vector<8x16xi32>
    %3 = tpu.iota {dimensions = array<i32: 1>} : vector<8x24xi32>
    %4 = vector.broadcast %0 : vector<8x1xi32> to vector<8x16xi32>
    %5 = arith.cmpi eq, %4, %2 : vector<8x16xi32>
    %6 = arith.extui %5 : vector<8x16xi1> to vector<8x16xi32>
    %7 = arith.sitofp %6 : vector<8x16xi32> to vector<8x16xf32>
    %8 = vector.broadcast %1 : vector<8x1xi32> to vector<8x24xi32>
    %9 = arith.cmpi eq, %8, %3 : vector<8x24xi32>
    %10 = arith.extui %9 : vector<8x24xi1> to vector<8x24xi32>
    %11 = arith.sitofp %10 : vector<8x24xi32> to vector<8x24xf32>
    %c0_3 = arith.constant 0 : index
    %c0_4 = arith.constant 0 : index
    %12 = vector.load %arg3[%c0_3, %c0_4] : memref<16x32xf32, #tpu.memory_space<vmem>>, vector<16x32xf32>
    %cst = arith.constant dense<0.000000e+00> : vector<8x32xf32>
    %13 = tpu.matmul %7, %12, %cst {dimension_numbers = #tpu.dot_dimension_numbers<[1], [0], [0], [1], [0, 0, 1, 1], [], []>} : vector<8x16xf32>, vector<16x32xf32>, vector<8x32xf32> -> vector<8x32xf32>
    %c0_5 = arith.constant 0 : index
    %c0_6 = arith.constant 0 : index
    %14 = vector.load %arg4[%c0_5, %c0_6] : memref<24x32xf32, #tpu.memory_space<vmem>>, vector<24x32xf32>
    %cst_7 = arith.constant dense<0.000000e+00> : vector<8x32xf32>
    %15 = tpu.matmul %11, %14, %cst_7 {dimension_numbers = #tpu.dot_dimension_numbers<[1], [0], [0], [1], [0, 0, 1, 1], [], []>} : vector<8x24xf32>, vector<24x32xf32>, vector<8x32xf32> -> vector<8x32xf32>
    %16 = arith.mulf %13, %15 : vector<8x32xf32>
    %cst_8 = arith.constant dense<0.000000e+00> : vector<8xf32>
    %17 = vector.multi_reduction <add>, %16, %cst_8 [1] : vector<8x32xf32> to vector<8xf32>
    %18 = vector.shape_cast %17 : vector<8xf32> to vector<1x8xf32>
    %c0_9 = arith.constant 0 : index
    %c0_10 = arith.constant 0 : index
    %19 = vector.load %arg5[%c0_9, %c0_10] : memref<1x8xf32, #tpu.memory_space<vmem>>, vector<1x8xf32>
    tpu.vector_store %arg5[%c0_9, %c0_10], %18 {strides = array<i32>} : memref<1x8xf32, #tpu.memory_space<vmem>>, vector<1x8xf32>,
    return
  }
  func.func @transform_0(%arg0: i32) -> (i32, i32) {
    %c0_i32 = arith.constant 0 : i32
    %c0_i32_0 = arith.constant 0 : i32
    return %arg0, %c0_i32 : i32, i32
  }
  func.func @transform_1(%arg0: i32) -> (i32, i32) {
    %c0_i32 = arith.constant 0 : i32
    %c0_i32_0 = arith.constant 0 : i32
    return %arg0, %c0_i32 : i32, i32
  }
  func.func @transform_2(%arg0: i32) -> (i32, i32) {
    %c0_i32 = arith.constant 0 : i32
    %c0_i32_0 = arith.constant 0 : i32
    %c0_i32_1 = arith.constant 0 : i32
    return %c0_i32, %c0_i32_0 : i32, i32
  }
  func.func @transform_3(%arg0: i32) -> (i32, i32) {
    %c0_i32 = arith.constant 0 : i32
    %c0_i32_0 = arith.constant 0 : i32
    %c0_i32_1 = arith.constant 0 : i32
    return %c0_i32, %c0_i32_0 : i32, i32
  }
  func.func @transform_4(%arg0: i32) -> (i32, i32) {
    %c0_i32 = arith.constant 0 : i32
    %c0_i32_0 = arith.constant 0 : i32
    return %c0_i32, %arg0 : i32, i32
  }
}

</mosaic_0001>

<bundles_post_ra>
// kernel: tpu_custom_call.1
= control target key start
LH: loop header
LB: loop body
LE: loop exit
PB: predicated region body
PF: predicated region fallthrough
CT: control target
= control target key end

     0   :  { %9 = vsyncpa [#allocation3], 0  ;;  %s242_s0 = inlined_call_operand.vmem [shape: s32[8,1], index: 0, kind: input, shape index: {}]   ;;  %s243_s1 = inlined_call_operand.vmem [shape: s32[8,1], index: 1, kind: input, shape index: {}]   ;;  %s244_s2 = inlined_call_operand.vmem [shape: f32[16,32], index: 2, kind: input, shape index: {}]   ;;  %s245_s3 = inlined_call_operand.hbm [shape: f32[24,32], index: 3, kind: input, shape index: {}]   ;;  %s246_s4 = inlined_call_operand.hbm [shape: f32[1,8], index: 4, kind: output, shape index: {}]  }
   0x1   :  { %10 = vsyncpa [#allocation4], 0  ;;  %s21_s17 = sshll.u32 %s245_s3, 4  ;;  %s193_s18 = smov [#allocation2]   ;;  %s22_s17 = int_to_ptr.hbm [resolvable:$true] %s21_s17 }
   0x2   :  { %s23_s19 = sshll.u32 %s193_s18, 4  ;;  %s194_s20 = smov 128   ;;  %s24_s19 = int_to_ptr.vmem [resolvable:$true] %s23_s19 }
   0x3   :  { %s195_s21 = smov 8  }
   0x4   :  { %29 = dma.hbm_to_vmem [thread:$0]  %s22_s17, 384, %s24_s19, [#allocation3], %s194_s20, %s194_s20, %s195_s21  }
   0x5   :  { %189 = dma.done.wait [#allocation3], 384  }
   0x6   :  { %190 = vsyncadd [#allocation3], 4294966912  ;;  %v196_v0 = vmov 0   ;;  %v34_v1 = vld [vmem:[%s242_s0] sm:$0xff]  ;;  %v51_v2 = vld [vmem:[%s244_s2 + $0x8] sm:$0xff]  ;;  %v36_v8 = vlaneseq  ;;  %vm52_vm0 = vcmask 130048  }
   0x7   :  { %140 = vset.pattern.permute.xlu0 %v196_v0  ;;  %70 = vmatpush.msra.mxu0 %v51_v2  ;;  %v35_v3 = vld [vmem:[%s243_s1] sm:$0xff]  ;;  %v78_v5 = vld [vmem:[#allocation2 + $0x10] sm:$0xff]  ;;  %v77_v6 = vld [vmem:[#allocation2 + $0x8] sm:$0xff]  ;;  %v197_v11 = vmov 0.0   ;;  %vm79_vm2 = vcmask 195584   ;;  %vm104_vm4 = vcmask 261120  }
   0x8   :  { %39 = vperm.xlu0 %140, %v34_v1   ;;  %v50_v4 = vld [vmem:[%s244_s2] sm:$0xff]  ;;  %96 = vmatpush.msra.mxu1 %v78_v5  ;;  %v37_v9 = vand.u32 127, %v36_v8  ;;  %s198_s0 = smov [#allocation5]   ;;  %s120_s30 = sshll.u32 %s246_s4, 4  ;;  %vm111_vm5 = vcmask 57344   ;;  %s121_s30 = int_to_ptr.hbm [resolvable:$true] %s120_s30 }
   0x9   :  { %71 = vmatpush.msra.mxu0 %v50_v4  ;;  %v76_v7 = vld [vmem:[#allocation2] sm:$0xff]  ;;  %s118_s1 = sshll.u32 %s198_s0, 4  ;;  %s119_s1 = int_to_ptr.vmem [resolvable:$true] %s118_s1 }
   0xa   :  { %97 = vmatpush.msra.mxu1 %v77_v6 }
   0xc   :  { %98 = vmatpush.msra.mxu1 %v76_v7 }
  0x10   :  { %45 = vperm.xlu0 %140, %v35_v3  }
  0x7a   :  { %v40_v10 = vpop.permute.xlu0 %39 }
  0x7b   :  { %vm41_vm1 = vcmp.eq.s32.totalorder %v40_v10, %v37_v9 }
  0x7c   :  { %v130_v12 = vsel %vm41_vm1, 1.0, %v197_v11 }
  0x7d   :  { %132 = vmatmul.msk.f32.vlgmr.msra.gmra.mxu0 %vm52_vm0, %v130_v12 }
  0x82   :  { %v46_v13 = vpop.permute.xlu0 %45 }
  0x83   :  { %vm47_vm3 = vcmp.eq.s32.totalorder %v46_v13, %v37_v9 }
  0x84   :  { %v131_v14 = vsel %vm47_vm3, 1.0, %v197_v11 }
  0x85   :  { %133 = vmatmul.msk.f32.vlgmr.msra.gmra.mxu1 %vm79_vm2, %v131_v14 }
  0xfa   :  { %v73_v15 = vpop.f32.mrf.mxu0 }
 0x102   :  { %v100_v16 = vpop.f32.mrf.mxu1 }
 0x103   :  { %v103_v17 = vmul.f32 %v100_v16, %v73_v15 }
 0x105   :  { %v105_v18 = vsel %vm104_vm4, %v103_v17, 0.0 }
 0x106   :  { %106 = vadd.xlane.f32.xlu1 %v105_v18 }
 0x179   :  { %v107_v19 = vpop.xlane.xlu1 %106 }
 0x17a   :  { %v109_v20 = vperm.slane %v107_v19, %v37_v9 }
 0x17c   :  { %112 = vst.msk [vmem:[#allocation5] sm:$0x1] %vm111_vm5, %v109_v20 }
 0x17d   :  { %123 = dma.vmem_to_hbm [thread:$0]  %s119_s1, 16, %s121_s30, [#allocation4]  }
 0x17e   :  { %191 = dma.done.wait [#allocation4], 16  }
 0x17f   :  { %192 = vsyncadd [#allocation4], 4294967280 }
 0x180   :  { %128 = vsyncpa [#allocation3], 1 }
 0x181   :  { %129 = vsyncpa [#allocation4], 1 }

</bundles_post_ra>
